<compile_context>
chip_gen: v7x
topology: tpu7x:2x2x1
jax: 0.10.0
libtpu: 0.0.40
codegen_flags: <defaults>
</compile_context>

<pallas_src>
import jax
import jax.numpy as jnp
from jax.experimental import pallas as pl
from jax.experimental.pallas import tpu as pltpu

# Deterministic "parameters" from BBoxTransform.__init__ (mean / std buffers).
# MEAN is all-zero, so it is folded out of the kernel.  STD = [.1, .1, .2, .2].
STD_XY = 0.1
STD_WH = 0.2

LANE = 128                # fast axis: 32 anchors * 4 interleaved coords
MAX_BLOCK_ROWS = 4096     # 4096 * 128 * 4 B = 2 MiB per f32 operand tile
                          # (3 operands * 2 pipeline buffers ~= 12 MiB VMEM)


def _round_up(x, m):
    return (x + m - 1) // m * m


def _sublane_mult(dtype):
    # Native f32 tile is (8, 128); sub-32-bit dtypes pack along sublanes
    # (bf16 -> 16, int8/fp8 -> 32), and block_rows must respect that.
    return 8 * max(1, 4 // jnp.dtype(dtype).itemsize)


def _bbox_decode_kernel(boxes_ref, deltas_ref, out_ref):
    # boxes_ref / deltas_ref / out_ref: (block_rows, 128) VMEM tiles.
    # Lane i holds component (i % 4) of some anchor:
    #   i % 4 == 0 -> x0 / dx / out x_min
    #   i % 4 == 1 -> y0 / dy / out y_min
    #   i % 4 == 2 -> x1 / dw / out x_max
    #   i % 4 == 3 -> y1 / dh / out y_max
    v = boxes_ref[...].astype(jnp.float32)
    d = deltas_ref[...].astype(jnp.float32)

    # Per-lane pattern built once on a (1, LANE) row and broadcast along
    # sublanes (much cheaper than a full (block_rows, 128) iota + select).
    lane = jax.lax.broadcasted_iota(jnp.int32, (1, LANE), 1)
    is_lo = (lane & 2) == 0                         # lanes with i % 4 in {0, 1}
    std_row = jnp.where(is_lo, jnp.float32(STD_XY), jnp.float32(STD_WH))

    # Bring lane i+2 onto lane i (roll by -2 == roll by LANE-2 on a 128 axis):
    # at the %4==0 / %4==1 slots this yields x1 / y1, so wh = width / height.
    # INVARIANT: the roll wrap-around only lands on lanes 126/127 (i%4 in
    # {2,3}); every lane the final select keeps (i%4 in {0,1}, plus the +2
    # forward roll of `hi` below) reads strictly within the same 4-lane anchor,
    # so anchors never mix across the 128-lane row boundary.
    wh = pltpu.roll(v, shift=LANE - 2, axis=1) - v
    ctr = v + 0.5 * wh                  # ctr_x / ctr_y at the %4==0 / ==1 slots

    # deltas * std (std = [.1, .1, .2, .2] per anchor); mean == 0 is dropped.
    ds = d * std_row
    # scaled dw / dh (lanes %4==2 / ==3) moved onto the %4==0 / ==1 slots.
    dwh = pltpu.roll(ds, shift=LANE - 2, axis=1)

    pred_ctr = ctr + ds * wh                  # valid at %4==0 / ==1
    half_wh = 0.5 * jnp.exp(dwh) * wh         # 0.5*pred_w / 0.5*pred_h there
    # TODO(synk): no clamp on dw/dh before exp -- matches this module (and the
    # reference), unlike torchvision's decode which clamps at log(1000/16).

    lo = pred_ctr - half_wh                   # x_min / y_min (at %4==0 / ==1)
    hi = pred_ctr + half_wh                   # x_max / y_max (still there)
    # Single full-tile lane-dense store: x_min/y_min stay in place, x_max/y_max
    # are rotated forward by 2 lanes into the %4==2 / ==3 slots.
    out_ref[...] = jnp.where(is_lo, lo, pltpu.roll(hi, shift=2, axis=1))


def bbox_transform(boxes, deltas):
    """boxes, deltas: (B, N, 4) -> pred_boxes: (B, N, 4) float32."""
    B, N, C = boxes.shape
    assert C == 4 and deltas.shape == boxes.shape

    total = B * N * 4
    # Lane remainder: only hit when B*N*4 is not a multiple of 128 (B*N not a
    # multiple of 32); typical anchor counts are aligned and take the
    # copy-free path (no jnp.pad, no output slice).
    pad = (-total) % LANE
    flat_b = boxes.reshape(-1)
    flat_d = deltas.reshape(-1)
    if pad:
        flat_b = jnp.pad(flat_b, (0, pad))
        flat_d = jnp.pad(flat_d, (0, pad))
    rows = (total + pad) // LANE
    b2 = flat_b.reshape(rows, LANE)          # free row-major view
    d2 = flat_d.reshape(rows, LANE)

    # Block sizing: ~2 MiB tiles, block_rows a multiple of the sublane packing.
    # Keep >= 2 (and even) blocks whenever there is enough work so the
    # "parallel" grid axis shards evenly across both v7x TensorCores
    # (no-op on single-TC v5e/v6e).  The ragged last block is masked by Pallas.
    sub = max(_sublane_mult(boxes.dtype), _sublane_mult(deltas.dtype), 8)
    rows_sub = _round_up(rows, sub)
    num_blocks = max(2, pl.cdiv(rows_sub, MAX_BLOCK_ROWS))
    if num_blocks % 2:
        num_blocks += 1
    block_rows = min(_round_up(pl.cdiv(rows_sub, num_blocks), sub), rows_sub)
    grid = pl.cdiv(rows, block_rows)

    spec = pl.BlockSpec((block_rows, LANE), lambda i: (i, 0))
    out2 = pl.pallas_call(
        _bbox_decode_kernel,
        out_shape=jax.ShapeDtypeStruct((rows, LANE), jnp.float32),
        grid_spec=pltpu.PrefetchScalarGridSpec(
            num_scalar_prefetch=0,
            grid=(grid,),
            in_specs=[spec, spec],
            out_specs=spec,
        ),
        compiler_params=pltpu.CompilerParams(
            dimension_semantics=("parallel",)),
    )(b2, d2)

    out = out2.reshape(-1)
    if pad:
        out = out[:total]
    return out.reshape(B, N, 4)


def _reference(boxes, deltas):
    mean = jnp.asarray([0.0, 0.0, 0.0, 0.0], jnp.float32)
    std = jnp.asarray([0.1, 0.1, 0.2, 0.2], jnp.float32)
    widths = boxes[:, :, 2] - boxes[:, :, 0]
    heights = boxes[:, :, 3] - boxes[:, :, 1]
    ctr_x = boxes[:, :, 0] + 0.5 * widths
    ctr_y = boxes[:, :, 1] + 0.5 * heights
    dx = deltas[:, :, 0] * std[0] + mean[0]
    dy = deltas[:, :, 1] * std[1] + mean[1]
    dw = deltas[:, :, 2] * std[2] + mean[2]
    dh = deltas[:, :, 3] * std[3] + mean[3]
    pred_ctr_x = ctr_x + dx * widths
    pred_ctr_y = ctr_y + dy * heights
    pred_w = jnp.exp(dw) * widths
    pred_h = jnp.exp(dh) * heights
    return jnp.stack([pred_ctr_x - 0.5 * pred_w,
                      pred_ctr_y - 0.5 * pred_h,
                      pred_ctr_x + 0.5 * pred_w,
                      pred_ctr_y + 0.5 * pred_h], axis=2)


if __name__ == "__main__":
    key = jax.random.PRNGKey(0)
    k1, k2, k3 = jax.random.split(key, 3)
    B, N = 2, 128

    # Well-formed boxes: x0,y0 in [0,50), x1 = x0 + w, y1 = y0 + h, w,h > 0.
    xy = jax.random.uniform(k1, (B, N, 2), jnp.float32, 0.0, 50.0)
    wh = jax.random.uniform(k2, (B, N, 2), jnp.float32, 1.0, 30.0)
    boxes = jnp.concatenate([xy, xy + wh], axis=2)            # (B, N, 4)
    deltas = jax.random.normal(k3, (B, N, 4), jnp.float32)

    out = jax.block_until_ready(bbox_transform(boxes, deltas))

    ref = _reference(boxes, deltas)
    assert out.shape == (B, N, 4)
    assert jnp.allclose(out, ref, atol=1e-4, rtol=1e-4), float(
        jnp.max(jnp.abs(out - ref)))
    print("KERNEL_OK")
</pallas_src>

<mosaic_0001>
module attributes {stable_mosaic.version = 11 : i64} {
  func.func @_bbox_decode_kernel(%arg0: i32, %arg1: memref<8x128xf32, #tpu.memory_space<vmem>>, %arg2: memref<8x128xf32, #tpu.memory_space<vmem>>, %arg3: memref<8x128xf32, #tpu.memory_space<vmem>>) attributes {dimension_semantics = [#tpu.dimension_semantics<parallel>], iteration_bounds = array<i64: 1>, scalar_prefetch = 0 : i64, scratch_operands = 0 : i64, tpu.core_type = #tpu.core_type<tc>, window_params = [{transform_indices = @transform_0, window_bounds = array<i64: 8, 128>}, {transform_indices = @transform_1, window_bounds = array<i64: 8, 128>}, {transform_indices = @transform_2, window_bounds = array<i64: 8, 128>}]} {
    %c0 = arith.constant 0 : index
    %c0_0 = arith.constant 0 : index
    %0 = vector.load %arg1[%c0, %c0_0] : memref<8x128xf32, #tpu.memory_space<vmem>>, vector<8x128xf32>
    %c0_1 = arith.constant 0 : index
    %c0_2 = arith.constant 0 : index
    %1 = vector.load %arg2[%c0_1, %c0_2] : memref<8x128xf32, #tpu.memory_space<vmem>>, vector<8x128xf32>
    %2 = tpu.iota {dimensions = array<i32: 1>} : vector<1x128xi32>
    %c2_i32 = arith.constant 2 : i32
    %3 = vector.broadcast %c2_i32 : i32 to vector<1x128xi32>
    %4 = arith.andi %2, %3 : vector<1x128xi32>
    %c0_i32 = arith.constant 0 : i32
    %5 = vector.broadcast %c0_i32 : i32 to vector<1x128xi32>
    %6 = arith.cmpi eq, %4, %5 : vector<1x128xi32>
    %cst = arith.constant 1.000000e-01 : f32
    %cst_3 = arith.constant 2.000000e-01 : f32
    %7 = vector.broadcast %cst : f32 to vector<1x128xf32>
    %8 = vector.broadcast %cst_3 : f32 to vector<1x128xf32>
    %9 = arith.select %6, %7, %8 : vector<1x128xi1>, vector<1x128xf32>
    %c126_i32 = arith.constant 126 : i32
    %10 = tpu.dynamic_rotate %0 by %c126_i32 dim 1 : vector<8x128xf32>, i32 -> vector<8x128xf32>
    %11 = arith.subf %10, %0 : vector<8x128xf32>
    %cst_4 = arith.constant 5.000000e-01 : f32
    %12 = vector.broadcast %cst_4 : f32 to vector<8x128xf32>
    %13 = arith.mulf %12, %11 : vector<8x128xf32>
    %14 = arith.addf %0, %13 : vector<8x128xf32>
    %15 = vector.broadcast %9 : vector<1x128xf32> to vector<8x128xf32>
    %16 = arith.mulf %1, %15 : vector<8x128xf32>
    %c126_i32_5 = arith.constant 126 : i32
    %17 = tpu.dynamic_rotate %16 by %c126_i32_5 dim 1 : vector<8x128xf32>, i32 -> vector<8x128xf32>
    %18 = arith.mulf %16, %11 : vector<8x128xf32>
    %19 = arith.addf %14, %18 : vector<8x128xf32>
    %20 = math.exp %17 : vector<8x128xf32>
    %cst_6 = arith.constant 5.000000e-01 : f32
    %21 = vector.broadcast %cst_6 : f32 to vector<8x128xf32>
    %22 = arith.mulf %21, %20 : vector<8x128xf32>
    %23 = arith.mulf %22, %11 : vector<8x128xf32>
    %24 = arith.subf %19, %23 : vector<8x128xf32>
    %25 = arith.addf %19, %23 : vector<8x128xf32>
    %c2_i32_7 = arith.constant 2 : i32
    %26 = tpu.dynamic_rotate %25 by %c2_i32_7 dim 1 : vector<8x128xf32>, i32 -> vector<8x128xf32>
    %27 = vector.shape_cast %6 : vector<1x128xi1> to vector<1x128xi1>
    %28 = vector.broadcast %27 : vector<1x128xi1> to vector<8x128xi1>
    %29 = arith.select %28, %24, %26 : vector<8x128xi1>, vector<8x128xf32>
    %c0_8 = arith.constant 0 : index
    %c0_9 = arith.constant 0 : index
    %30 = vector.load %arg3[%c0_8, %c0_9] : memref<8x128xf32, #tpu.memory_space<vmem>>, vector<8x128xf32>
    tpu.vector_store %arg3[%c0_8, %c0_9], %29 {strides = array<i32>} : memref<8x128xf32, #tpu.memory_space<vmem>>, vector<8x128xf32>,
    return
  }
  func.func @transform_0(%arg0: i32) -> (i32, i32) {
    %c0_i32 = arith.constant 0 : i32
    %c0_i32_0 = arith.constant 0 : i32
    return %arg0, %c0_i32 : i32, i32
  }
  func.func @transform_1(%arg0: i32) -> (i32, i32) {
    %c0_i32 = arith.constant 0 : i32
    %c0_i32_0 = arith.constant 0 : i32
    return %arg0, %c0_i32 : i32, i32
  }
  func.func @transform_2(%arg0: i32) -> (i32, i32) {
    %c0_i32 = arith.constant 0 : i32
    %c0_i32_0 = arith.constant 0 : i32
    return %arg0, %c0_i32 : i32, i32
  }
}

</mosaic_0001>

<bundles_post_ra>
// kernel: tpu_custom_call.1
= control target key start
LH: loop header
LB: loop body
LE: loop exit
PB: predicated region body
PF: predicated region fallthrough
CT: control target
= control target key end

     0   :  { %7 = vsyncpa [#allocation3], 0  ;;  %s226_s0 = inlined_call_operand.hbm [shape: f32[8,128], index: 0, kind: input, shape index: {}]   ;;  %s227_s1 = inlined_call_operand.hbm [shape: f32[8,128], index: 1, kind: input, shape index: {}]   ;;  %s228_s2 = inlined_call_operand.hbm [shape: f32[8,128], index: 2, kind: output, shape index: {}]  }
   0x1   :  { %8 = vsyncpa [#allocation6], 0 }
   0x2   :  { %9 = vsyncpa [#allocation4], 0  ;;  %s161_s9 = smov [#allocation2]   ;;  %s162_s11 = smov [#allocation5]  }
   0x3   :  { %s16_s10 = sshll.u32 %s161_s9, 4  ;;  %s26_s12 = sshll.u32 %s162_s11, 4  ;;  %s17_s10 = int_to_ptr.vmem [resolvable:$true] %s16_s10  ;;  %s27_s12 = int_to_ptr.vmem [resolvable:$true] %s26_s12 }
   0x4   :  { %s89_s15 = scalar_lea.hbm %s226_s0, 128 }
   0x5   :  { %p90_p0 = scmp.ne.s32.totalorder %s226_s0, %s89_s15  ;;  %p93_p1 = scmp.lt.u32.totalorder %s89_s15, %s226_s0 }
   0x7   :  { %p95_p2 = pnand %p93_p1, %p90_p0 }
   0x9   :  { %98 = shalt.err (!%p95_p2)
}
   0xa   :  { %s99_s20 = scalar_lea.vmem %s17_s10, 128  ;;  %p104_p4 = scmp.lt.s32.totalorder %s17_s10, %s17_s10 }
   0xb   :  { %p100_p3 = scmp.ne.s32.totalorder %s17_s10, %s99_s20  ;;  %p105_p5 = scmp.lt.s32.totalorder %s99_s20, %s99_s20 }
   0xd   :  { %p106_p6 = por %p105_p5, %p104_p4 }
   0xf   :  { %p107_p7 = pnand %p106_p6, %p100_p3 }
  0x11   :  { %110 = shalt.err (!%p107_p7)
}
  0x12   :  { %19 = dma.hbm_to_vmem [thread:$0]  %s226_s0, 128, %s17_s10, [#allocation3]  }
  0x13   :  { %s111_s25 = scalar_lea.hbm %s227_s1, 128 }
  0x14   :  { %p112_p8 = scmp.ne.s32.totalorder %s227_s1, %s111_s25  ;;  %p115_p9 = scmp.lt.u32.totalorder %s111_s25, %s227_s1 }
  0x16   :  { %p117_p10 = pnand %p115_p9, %p112_p8 }
  0x18   :  { %120 = shalt.err (!%p117_p10)
}
  0x19   :  { %s121_s30 = scalar_lea.vmem %s27_s12, 128  ;;  %p126_p12 = scmp.lt.s32.totalorder %s27_s12, %s27_s12 }
  0x1a   :  { %p122_p11 = scmp.ne.s32.totalorder %s27_s12, %s121_s30  ;;  %p127_p13 = scmp.lt.s32.totalorder %s121_s30, %s121_s30 }
  0x1c   :  { %p128_p0 = por %p127_p13, %p126_p12 }
  0x1e   :  { %p129_p1 = pnand %p128_p0, %p122_p11 }
  0x20   :  { %132 = shalt.err (!%p129_p1)
}
  0x21   :  { %29 = dma.hbm_to_vmem [thread:$0]  %s227_s1, 128, %s27_s12, [#allocation6]  }
  0x22   :  { %155 = dma.done.wait [#allocation3], 128  }
  0x23   :  { %156 = vsyncadd [#allocation3], 4294967168 }
  0x24   :  { %157 = dma.done.wait [#allocation6], 128  }
  0x25   :  { %158 = vsyncadd [#allocation6], 4294967168  ;;  %v38_v0 = vlaneseq  ;;  %v37_v4 = vld [vmem:[#allocation5] sm:$0xff]  ;;  %v163_v5 = vmov 0.2   ;;  %s164_s4 = smov 126  }
  0x26   :  { %v36_v8 = vld [vmem:[#allocation2] sm:$0xff]  ;;  %s165_s1 = smov 2   ;;  %s166_s5 = smov [#allocation7]  }
  0x27   :  { %v39_v1 = vand.u32 127, %v38_v0  ;;  %s71_s6 = sshll.u32 %s166_s5, 4  ;;  %s72_s6 = int_to_ptr.vmem [resolvable:$true] %s71_s6 }
  0x28   :  { %s133_s7 = scalar_lea.vmem %s72_s6, 128  ;;  %p138_p3 = scmp.lt.s32.totalorder %s72_s6, %s72_s6 }
  0x29   :  { %v40_v2 = vand.u32 2, %v39_v1  ;;  %p134_p2 = scmp.ne.s32.totalorder %s72_s6, %s133_s7  ;;  %p139_p4 = scmp.lt.s32.totalorder %s133_s7, %s133_s7 }
  0x2b   :  { %vm206_vm0 = vcmp.eq.s32.totalorder %v40_v2, 0  ;;  %p140_p5 = por %p139_p4, %p138_p3 }
  0x2c   :  { %v42_v6 = vsel %vm206_vm0, 0.1, %v163_v5 }
  0x2d   :  { %v48_v7 = vmul.f32 %v42_v6, %v37_v4  ;;  %p141_p6 = pnand %p140_p5, %p134_p2 }
  0x2f   :  { %49 = vrot.lane.b32.xlu0 %v48_v7, %s164_s4 }
  0x33   :  { %43 = vrot.lane.b32.xlu0 %v36_v8, %s164_s4 }
  0xa1   :  { %v50_v9 = vpop.permute.xlu0 %49 }
  0xa2   :  { %v53_v10 = vmul.f32 1.442695, %v50_v9 }
  0xa4   :  { %87 = vpow2.f32 %v53_v10 }
  0xa5   :  { %v44_v11 = vpop.permute.xlu0 %43 }
  0xa6   :  { %v45_v12 = vsub.f32 %v44_v11, %v36_v8 }
  0xa8   :  { %v46_v13 = vmul.f32 0.5, %v45_v12  ;;  %v51_v14 = vmul.f32 %v48_v7, %v45_v12 }
  0xaa   :  { %v47_v15 = vadd.f32 %v46_v13, %v36_v8 }
  0xac   :  { %v52_v18 = vadd.f32 %v51_v14, %v47_v15 }
  0xae   :  { %v88_v16 = vpop.eup %87 }
  0xaf   :  { %v55_v17 = vmul.f32 0.5, %v88_v16 }
  0xb1   :  { %v56_v19 = vmul.f32 %v55_v17, %v45_v12 }
  0xb3   :  { %v58_v20 = vadd.f32 %v56_v19, %v52_v18  ;;  %v57_v21 = vsub.f32 %v52_v18, %v56_v19 }
  0xb5   :  { %59 = vrot.lane.b32.xlu1 %v58_v20, %s165_s1 }
 0x127   :  { %v60_v22 = vpop.permute.xlu1 %59 }
 0x128   :  { %v63_v23 = vsel %vm206_vm0, %v57_v21, %v60_v22 }
 0x129   :  { %64 = vst [vmem:[#allocation7] sm:$0xff] %v63_v23 }
 0x12a   :  { %144 = shalt.err (!%p141_p6)
}
 0x12b   :  { %s145_s10 = scalar_lea.hbm %s228_s2, 128 }
 0x12c   :  { %p146_p7 = scmp.ne.s32.totalorder %s228_s2, %s145_s10  ;;  %p149_p8 = scmp.lt.u32.totalorder %s145_s10, %s228_s2 }
 0x12e   :  { %p151_p9 = pnand %p149_p8, %p146_p7 }
 0x130   :  { %154 = shalt.err (!%p151_p9)
}
 0x131   :  { %74 = dma.vmem_to_hbm [thread:$0]  %s72_s6, 128, %s228_s2, [#allocation4]  }
 0x132   :  { %159 = dma.done.wait [#allocation4], 128  }
 0x133   :  { %160 = vsyncadd [#allocation4], 4294967168 }
 0x134   :  { %78 = vsyncpa [#allocation3], 1 }
 0x135   :  { %79 = vsyncpa [#allocation6], 1 }
 0x136   :  { %80 = vsyncpa [#allocation4], 1 }

</bundles_post_ra>
